<compile_context>
chip_gen: v6e
topology: v6e:2x2x1
jax: 0.10.0
libtpu: 0.0.40
codegen_flags: <defaults>
</compile_context>

<pallas_src>
import math

import jax
import jax.numpy as jnp
from jax.experimental import pallas as pl
from jax.experimental.pallas import tpu as pltpu

INPUT_DIM = 10      # L  (spec: input_dim = 10)
C1 = 32
C2 = 64
HIDDEN = 128        # latent_dim / hidden_dim
NUM_CLASSES = 4
K = 3
OUT_W = 8           # combined output lanes: cls in [0:4], dom in [4:6], rest zero padding


def _dann_kernel(x_ref, w1_ref, b1_ref, w2_ref, b2_ref, wfc_ref, bfc_ref,
                 wh1_ref, bh1_ref, wc2_ref, bc2_ref, wfin_ref, bfin_ref,
                 out_ref):
    """x_ref: (TB, 10).  out_ref: (TB, 8) = [class logits (4) | domain logits (2) | pad]."""
    xb = x_ref[...].astype(jnp.bfloat16)                                    # (TB, 10)

    # ---- Conv1 (in_ch=1, padding=1) as a single banded matmul: (TB,10)@(10,320) ----
    h1 = jnp.maximum(jnp.dot(xb, w1_ref[...], preferred_element_type=jnp.float32)
                     + b1_ref[...], 0.0)                                    # (TB, 320)

    # ---- Conv2 (32->64, padding=1) as a single block-banded matmul: (TB,320)@(320,640) ----
    # Output feature index = position*64 + out_channel (position-major flatten).
    h2 = jnp.maximum(jnp.dot(h1.astype(jnp.bfloat16), w2_ref[...],
                             preferred_element_type=jnp.float32) + b2_ref[...], 0.0)  # (TB,640)

    # ---- Linear(640 -> 128) + ReLU (FC weight re-ordered in the wrapper to absorb the
    #      position-major vs PyTorch channel-major flatten difference) ----
    z = jnp.maximum(jnp.dot(h2.astype(jnp.bfloat16), wfc_ref[...],
                            preferred_element_type=jnp.float32) + bfc_ref[...], 0.0)  # (TB,128)
    zb = z.astype(jnp.bfloat16)

    # ---- Fused head layer 1: [label-classifier Linear(128->128) | domain Linear(128->64)]
    #      (Dropout = identity at inference; GRL forward = identity) ----
    h = jnp.maximum(jnp.dot(zb, wh1_ref[...], preferred_element_type=jnp.float32)
                    + bh1_ref[...], 0.0)                                    # (TB, 192)
    y = h[:, :128]                                                          # classifier branch
    d = h[:, 128:]                                                          # domain branch

    # ---- Classifier layer 2: Linear(128 -> 64) + ReLU ----
    y2 = jnp.maximum(jnp.dot(y.astype(jnp.bfloat16), wc2_ref[...],
                             preferred_element_type=jnp.float32) + bc2_ref[...], 0.0)  # (TB,64)

    # ---- Fused final layers (block-diag): [cls3 on y2 | dom2 on d] -> (TB, 8), one store ----
    yd = jnp.concatenate([y2, d], axis=-1).astype(jnp.bfloat16)             # (TB, 128)
    out_ref[...] = jnp.dot(yd, wfin_ref[...],
                           preferred_element_type=jnp.float32) + bfin_ref[...]


def init_params(key):
    """PyTorch-default-style (uniform +/- 1/sqrt(fan_in)) deterministic init."""
    ks = jax.random.split(key, 16)

    def uinit(k, shape, fan_in):
        b = 1.0 / math.sqrt(fan_in)
        return jax.random.uniform(k, shape, jnp.float32, -b, b)

    return {
        "conv1_w": uinit(ks[0], (C1, 1, K), 1 * K),
        "conv1_b": uinit(ks[1], (C1,), 1 * K),
        "conv2_w": uinit(ks[2], (C2, C1, K), C1 * K),
        "conv2_b": uinit(ks[3], (C2,), C1 * K),
        "fc_w":    uinit(ks[4], (HIDDEN, C2 * INPUT_DIM), C2 * INPUT_DIM),
        "fc_b":    uinit(ks[5], (HIDDEN,), C2 * INPUT_DIM),
        "cls1_w":  uinit(ks[6], (128, HIDDEN), HIDDEN),
        "cls1_b":  uinit(ks[7], (128,), HIDDEN),
        "cls2_w":  uinit(ks[8], (64, 128), 128),
        "cls2_b":  uinit(ks[9], (64,), 128),
        "cls3_w":  uinit(ks[10], (NUM_CLASSES, 64), 64),
        "cls3_b":  uinit(ks[11], (NUM_CLASSES,), 64),
        "dom1_w":  uinit(ks[12], (64, HIDDEN), HIDDEN),
        "dom1_b":  uinit(ks[13], (64,), HIDDEN),
        "dom2_w":  uinit(ks[14], (2, 64), 64),
        "dom2_b":  uinit(ks[15], (2,), 64),
    }


def _pick_tb(batch):
    """Batch tile: large enough to fill the 256-row MXU (v6e/v7x) and amortize the ~0.35us
    per-grid-step overhead, but split so the grid has >= 2 steps when possible (v7x dual TC),
    capped at 512 rows to stay well inside default scoped VMEM on every generation."""
    if batch <= 16:
        return batch
    half = -(-batch // 2)                       # cdiv(batch, 2)
    return min(512, ((half + 7) // 8) * 8)


def dann_forward(x, params, alpha=0.0):
    """x: (B, INPUT_DIM) f32 -> (class_outputs (B, NUM_CLASSES), domain_outputs (B, 2)).

    alpha only scales the reversed gradient in GRL.backward; the forward pass ignores it.
    """
    del alpha
    B, seq_len = x.shape
    assert seq_len == INPUT_DIM

    f32, bf16 = jnp.float32, jnp.bfloat16
    L = INPUT_DIM

    # --- glue: parameter re-layouts / dtype casts (no hot-path compute) ---
    # Banded conv1 weight: W1[i, p*C1 + c] = conv1_w[c, 0, k] where i = p + k - 1 (valid i only;
    # the truncated band rows at the boundaries ARE the padding=1 zero taps).
    w1_ck = params["conv1_w"][:, 0, :]                                       # (32, 3) [c, k]
    w1 = jnp.zeros((L, L * C1), f32)
    for p in range(L):
        for k in range(K):
            i = p + k - 1
            if 0 <= i < L:
                w1 = w1.at[i, p * C1:(p + 1) * C1].set(w1_ck[:, k])
    w1 = w1.astype(bf16)
    b1 = jnp.tile(params["conv1_b"], L).reshape(1, L * C1).astype(f32)       # (1, 320)

    # Block-banded conv2 weight: W2[p*C1 + c, l*C2 + o] = conv2_w[o, c, k] where p = l + k - 1.
    w2_ock = params["conv2_w"]                                               # (64, 32, 3)
    w2 = jnp.zeros((L * C1, L * C2), f32)
    for l in range(L):
        for k in range(K):
            p = l + k - 1
            if 0 <= p < L:
                w2 = w2.at[p * C1:(p + 1) * C1, l * C2:(l + 1) * C2].set(w2_ock[:, :, k].T)
    w2 = w2.astype(bf16)
    b2 = jnp.tile(params["conv2_b"], L).reshape(1, L * C2).astype(f32)       # (1, 640)

    # PyTorch flattens channel-major (feat = c*L + l); the kernel produces position-major
    # (feat = l*C2 + c) -> permute the FC weight accordingly (pure glue, exact).
    wfc = jnp.transpose(params["fc_w"].reshape(HIDDEN, C2, L),
                        (2, 1, 0)).reshape(L * C2, HIDDEN).astype(bf16)      # (640, 128)
    bfc = params["fc_b"].reshape(1, HIDDEN).astype(f32)

    # Fused head layer-1: [cls1 (128->128) | dom1 (128->64)] -> one (128, 192) weight.
    wh1 = jnp.concatenate([params["cls1_w"].T, params["dom1_w"].T], axis=1).astype(bf16)
    bh1 = jnp.concatenate([params["cls1_b"], params["dom1_b"]]).reshape(1, 192).astype(f32)

    wc2 = params["cls2_w"].T.astype(bf16)                                    # (128, 64)
    bc2 = params["cls2_b"].reshape(1, 64).astype(f32)

    # Fused final layers, block-diagonal on concat([y2, d]): (128, 8).
    wfin = jnp.zeros((128, OUT_W), f32)
    wfin = wfin.at[:64, :NUM_CLASSES].set(params["cls3_w"].T)
    wfin = wfin.at[64:, NUM_CLASSES:NUM_CLASSES + 2].set(params["dom2_w"].T)
    wfin = wfin.astype(bf16)
    bfin = jnp.zeros((1, OUT_W), f32)
    bfin = bfin.at[0, :NUM_CLASSES].set(params["cls3_b"])
    bfin = bfin.at[0, NUM_CLASSES:NUM_CLASSES + 2].set(params["dom2_b"])

    weights = (w1, b1, w2, b2, wfc, bfc, wh1, bh1, wc2, bc2, wfin, bfin)

    # --- tiling: pad B up to a multiple of the batch tile ---
    tb = _pick_tb(B)
    Bp = -(-B // tb) * tb
    x_in = x.astype(f32)
    if Bp != B:
        x_in = jnp.zeros((Bp, L), f32).at[:B].set(x_in)
    grid = (Bp // tb,)

    in_specs = [pl.BlockSpec((tb, L), lambda i: (i, 0))]
    in_specs += [pl.BlockSpec(w.shape, lambda i: (0, 0)) for w in weights]
    out_specs = pl.BlockSpec((tb, OUT_W), lambda i: (i, 0))

    flops_per_row = 2 * (L * 320 + 320 * 640 + 640 * HIDDEN
                         + HIDDEN * 192 + HIDDEN * 64 + 128 * OUT_W)
    weight_bytes = sum(int(w.size) * w.dtype.itemsize for w in weights)
    cost = pl.CostEstimate(flops=flops_per_row * Bp, transcendentals=0,
                           bytes_accessed=4 * Bp * L + 4 * Bp * OUT_W + weight_bytes)

    out = pl.pallas_call(
        _dann_kernel,
        out_shape=jax.ShapeDtypeStruct((Bp, OUT_W), f32),
        grid=grid,
        in_specs=in_specs,
        out_specs=out_specs,
        compiler_params=pltpu.CompilerParams(dimension_semantics=("parallel",)),
        cost_estimate=cost,
    )(x_in, *weights)

    return out[:B, :NUM_CLASSES], out[:B, NUM_CLASSES:NUM_CLASSES + 2]


def _reference_forward(x, params):
    """Pure-JAX f32 reference mirroring the PyTorch module (eval mode) exactly."""
    def conv1d(x_ncl, w_oik, b_o):
        Ln = x_ncl.shape[-1]
        xp = jnp.pad(x_ncl, ((0, 0), (0, 0), (1, 1)))
        cols = jnp.stack([xp[:, :, k:k + Ln] for k in range(K)], axis=-1)   # (B, Cin, L, K)
        return jnp.einsum("bilk,oik->bol", cols, w_oik) + b_o[None, :, None]

    h1 = jax.nn.relu(conv1d(x[:, None, :], params["conv1_w"], params["conv1_b"]))
    h2 = jax.nn.relu(conv1d(h1, params["conv2_w"], params["conv2_b"]))
    flat = h2.reshape(x.shape[0], -1)                       # channel-major flatten (PyTorch)
    z = jax.nn.relu(flat @ params["fc_w"].T + params["fc_b"])
    y = jax.nn.relu(z @ params["cls1_w"].T + params["cls1_b"])
    y = jax.nn.relu(y @ params["cls2_w"].T + params["cls2_b"])
    cls = y @ params["cls3_w"].T + params["cls3_b"]
    d = jax.nn.relu(z @ params["dom1_w"].T + params["dom1_b"])
    dom = d @ params["dom2_w"].T + params["dom2_b"]
    return cls, dom


if __name__ == "__main__":
    key = jax.random.PRNGKey(0)
    k_param, k_x = jax.random.split(key)
    params = init_params(k_param)

    B = 4
    x = jax.random.normal(k_x, (B, INPUT_DIM), dtype=jnp.float32)

    cls_out, dom_out = dann_forward(x, params, alpha=1.0)
    cls_out, dom_out = jax.block_until_ready((cls_out, dom_out))

    cls_exp, dom_exp = _reference_forward(x, params)
    assert cls_out.shape == (B, NUM_CLASSES) and dom_out.shape == (B, 2)
    # bf16 matmul operands (incl. x) with f32 accumulation -> relaxed tolerance vs f32 ref.
    assert jnp.allclose(cls_out, cls_exp, atol=5e-2, rtol=5e-2), (
        f"class max abs err {jnp.max(jnp.abs(cls_out - cls_exp))}")
    assert jnp.allclose(dom_out, dom_exp, atol=5e-2, rtol=5e-2), (
        f"domain max abs err {jnp.max(jnp.abs(dom_out - dom_exp))}")

    print("KERNEL_OK")
</pallas_src>

<mosaic_0001>
module attributes {stable_mosaic.version = 11 : i64} {
  func.func @_dann_kernel(%arg0: i32, %arg1: memref<4x10xf32, #tpu.memory_space<vmem>>, %arg2: memref<10x320xbf16, #tpu.memory_space<vmem>>, %arg3: memref<1x320xf32, #tpu.memory_space<vmem>>, %arg4: memref<320x640xbf16, #tpu.memory_space<vmem>>, %arg5: memref<1x640xf32, #tpu.memory_space<vmem>>, %arg6: memref<640x128xbf16, #tpu.memory_space<vmem>>, %arg7: memref<1x128xf32, #tpu.memory_space<vmem>>, %arg8: memref<128x192xbf16, #tpu.memory_space<vmem>>, %arg9: memref<1x192xf32, #tpu.memory_space<vmem>>, %arg10: memref<128x64xbf16, #tpu.memory_space<vmem>>, %arg11: memref<1x64xf32, #tpu.memory_space<vmem>>, %arg12: memref<128x8xbf16, #tpu.memory_space<vmem>>, %arg13: memref<1x8xf32, #tpu.memory_space<vmem>>, %arg14: memref<4x8xf32, #tpu.memory_space<vmem>>) attributes {dimension_semantics = [#tpu.dimension_semantics<parallel>], iteration_bounds = array<i64: 1>, scalar_prefetch = 0 : i64, scratch_operands = 0 : i64, tpu.core_type = #tpu.core_type<tc>, window_params = [{transform_indices = @transform_0, window_bounds = array<i64: 4, 10>}, {pipeline_mode = #tpu.pipeline_mode<synchronous>, transform_indices = @transform_1, window_bounds = array<i64: 10, 320>}, {pipeline_mode = #tpu.pipeline_mode<synchronous>, transform_indices = @transform_2, window_bounds = array<i64: 1, 320>}, {pipeline_mode = #tpu.pipeline_mode<synchronous>, transform_indices = @transform_3, window_bounds = array<i64: 320, 640>}, {pipeline_mode = #tpu.pipeline_mode<synchronous>, transform_indices = @transform_4, window_bounds = array<i64: 1, 640>}, {pipeline_mode = #tpu.pipeline_mode<synchronous>, transform_indices = @transform_5, window_bounds = array<i64: 640, 128>}, {pipeline_mode = #tpu.pipeline_mode<synchronous>, transform_indices = @transform_6, window_bounds = array<i64: 1, 128>}, {pipeline_mode = #tpu.pipeline_mode<synchronous>, transform_indices = @transform_7, window_bounds = array<i64: 128, 192>}, {pipeline_mode = #tpu.pipeline_mode<synchronous>, transform_indices = @transform_8, window_bounds = array<i64: 1, 192>}, {pipeline_mode = #tpu.pipeline_mode<synchronous>, transform_indices = @transform_9, window_bounds = array<i64: 128, 64>}, {pipeline_mode = #tpu.pipeline_mode<synchronous>, transform_indices = @transform_10, window_bounds = array<i64: 1, 64>}, {pipeline_mode = #tpu.pipeline_mode<synchronous>, transform_indices = @transform_11, window_bounds = array<i64: 128, 8>}, {pipeline_mode = #tpu.pipeline_mode<synchronous>, transform_indices = @transform_12, window_bounds = array<i64: 1, 8>}, {transform_indices = @transform_13, window_bounds = array<i64: 4, 8>}]} {
    %c0 = arith.constant 0 : index
    %c0_0 = arith.constant 0 : index
    %0 = vector.load %arg1[%c0, %c0_0] : memref<4x10xf32, #tpu.memory_space<vmem>>, vector<4x10xf32>
    %1 = arith.truncf %0 : vector<4x10xf32> to vector<4x10xbf16>
    %c0_1 = arith.constant 0 : index
    %c0_2 = arith.constant 0 : index
    %2 = vector.load %arg2[%c0_1, %c0_2] : memref<10x320xbf16, #tpu.memory_space<vmem>>, vector<10x320xbf16>
    %cst = arith.constant dense<0.000000e+00> : vector<4x320xf32>
    %3 = tpu.matmul %1, %2, %cst {dimension_numbers = #tpu.dot_dimension_numbers<[1], [0], [0], [1], [0, 0, 1, 1], [], []>} : vector<4x10xbf16>, vector<10x320xbf16>, vector<4x320xf32> -> vector<4x320xf32>
    %c0_3 = arith.constant 0 : index
    %c0_4 = arith.constant 0 : index
    %4 = vector.load %arg3[%c0_3, %c0_4] : memref<1x320xf32, #tpu.memory_space<vmem>>, vector<1x320xf32>
    %5 = vector.broadcast %4 : vector<1x320xf32> to vector<4x320xf32>
    %6 = arith.addf %3, %5 : vector<4x320xf32>
    %cst_5 = arith.constant 0.000000e+00 : f32
    %7 = vector.broadcast %cst_5 : f32 to vector<4x320xf32>
    %8 = arith.maximumf %6, %7 : vector<4x320xf32>
    %9 = arith.truncf %8 : vector<4x320xf32> to vector<4x320xbf16>
    %c0_6 = arith.constant 0 : index
    %c0_7 = arith.constant 0 : index
    %10 = vector.load %arg4[%c0_6, %c0_7] : memref<320x640xbf16, #tpu.memory_space<vmem>>, vector<320x640xbf16>
    %cst_8 = arith.constant dense<0.000000e+00> : vector<4x640xf32>
    %11 = tpu.matmul %9, %10, %cst_8 {dimension_numbers = #tpu.dot_dimension_numbers<[1], [0], [0], [1], [0, 0, 1, 1], [], []>} : vector<4x320xbf16>, vector<320x640xbf16>, vector<4x640xf32> -> vector<4x640xf32>
    %c0_9 = arith.constant 0 : index
    %c0_10 = arith.constant 0 : index
    %12 = vector.load %arg5[%c0_9, %c0_10] : memref<1x640xf32, #tpu.memory_space<vmem>>, vector<1x640xf32>
    %13 = vector.broadcast %12 : vector<1x640xf32> to vector<4x640xf32>
    %14 = arith.addf %11, %13 : vector<4x640xf32>
    %cst_11 = arith.constant 0.000000e+00 : f32
    %15 = vector.broadcast %cst_11 : f32 to vector<4x640xf32>
    %16 = arith.maximumf %14, %15 : vector<4x640xf32>
    %17 = arith.truncf %16 : vector<4x640xf32> to vector<4x640xbf16>
    %c0_12 = arith.constant 0 : index
    %c0_13 = arith.constant 0 : index
    %18 = vector.load %arg6[%c0_12, %c0_13] : memref<640x128xbf16, #tpu.memory_space<vmem>>, vector<640x128xbf16>
    %cst_14 = arith.constant dense<0.000000e+00> : vector<4x128xf32>
    %19 = tpu.matmul %17, %18, %cst_14 {dimension_numbers = #tpu.dot_dimension_numbers<[1], [0], [0], [1], [0, 0, 1, 1], [], []>} : vector<4x640xbf16>, vector<640x128xbf16>, vector<4x128xf32> -> vector<4x128xf32>
    %c0_15 = arith.constant 0 : index
    %c0_16 = arith.constant 0 : index
    %20 = vector.load %arg7[%c0_15, %c0_16] : memref<1x128xf32, #tpu.memory_space<vmem>>, vector<1x128xf32>
    %21 = vector.broadcast %20 : vector<1x128xf32> to vector<4x128xf32>
    %22 = arith.addf %19, %21 : vector<4x128xf32>
    %cst_17 = arith.constant 0.000000e+00 : f32
    %23 = vector.broadcast %cst_17 : f32 to vector<4x128xf32>
    %24 = arith.maximumf %22, %23 : vector<4x128xf32>
    %25 = arith.truncf %24 : vector<4x128xf32> to vector<4x128xbf16>
    %c0_18 = arith.constant 0 : index
    %c0_19 = arith.constant 0 : index
    %26 = vector.load %arg8[%c0_18, %c0_19] : memref<128x192xbf16, #tpu.memory_space<vmem>>, vector<128x192xbf16>
    %cst_20 = arith.constant dense<0.000000e+00> : vector<4x192xf32>
    %27 = tpu.matmul %25, %26, %cst_20 {dimension_numbers = #tpu.dot_dimension_numbers<[1], [0], [0], [1], [0, 0, 1, 1], [], []>} : vector<4x128xbf16>, vector<128x192xbf16>, vector<4x192xf32> -> vector<4x192xf32>
    %c0_21 = arith.constant 0 : index
    %c0_22 = arith.constant 0 : index
    %28 = vector.load %arg9[%c0_21, %c0_22] : memref<1x192xf32, #tpu.memory_space<vmem>>, vector<1x192xf32>
    %29 = vector.broadcast %28 : vector<1x192xf32> to vector<4x192xf32>
    %30 = arith.addf %27, %29 : vector<4x192xf32>
    %cst_23 = arith.constant 0.000000e+00 : f32
    %31 = vector.broadcast %cst_23 : f32 to vector<4x192xf32>
    %32 = arith.maximumf %30, %31 : vector<4x192xf32>
    %33 = vector.extract_strided_slice %32 {offsets = [0, 0], sizes = [4, 128], strides = [1, 1]} : vector<4x192xf32> to vector<4x128xf32>
    %34 = vector.extract_strided_slice %32 {offsets = [0, 128], sizes = [4, 64], strides = [1, 1]} : vector<4x192xf32> to vector<4x64xf32>
    %35 = arith.truncf %33 : vector<4x128xf32> to vector<4x128xbf16>
    %c0_24 = arith.constant 0 : index
    %c0_25 = arith.constant 0 : index
    %36 = vector.load %arg10[%c0_24, %c0_25] : memref<128x64xbf16, #tpu.memory_space<vmem>>, vector<128x64xbf16>
    %cst_26 = arith.constant dense<0.000000e+00> : vector<4x64xf32>
    %37 = tpu.matmul %35, %36, %cst_26 {dimension_numbers = #tpu.dot_dimension_numbers<[1], [0], [0], [1], [0, 0, 1, 1], [], []>} : vector<4x128xbf16>, vector<128x64xbf16>, vector<4x64xf32> -> vector<4x64xf32>
    %c0_27 = arith.constant 0 : index
    %c0_28 = arith.constant 0 : index
    %38 = vector.load %arg11[%c0_27, %c0_28] : memref<1x64xf32, #tpu.memory_space<vmem>>, vector<1x64xf32>
    %39 = vector.broadcast %38 : vector<1x64xf32> to vector<4x64xf32>
    %40 = arith.addf %37, %39 : vector<4x64xf32>
    %cst_29 = arith.constant 0.000000e+00 : f32
    %41 = vector.broadcast %cst_29 : f32 to vector<4x64xf32>
    %42 = arith.maximumf %40, %41 : vector<4x64xf32>
    %43 = tpu.concatenate %42, %34 in 1 : vector<4x64xf32>, vector<4x64xf32> -> vector<4x128xf32>
    %44 = arith.truncf %43 : vector<4x128xf32> to vector<4x128xbf16>
    %c0_30 = arith.constant 0 : index
    %c0_31 = arith.constant 0 : index
    %45 = vector.load %arg12[%c0_30, %c0_31] : memref<128x8xbf16, #tpu.memory_space<vmem>>, vector<128x8xbf16>
    %cst_32 = arith.constant dense<0.000000e+00> : vector<4x8xf32>
    %46 = tpu.matmul %44, %45, %cst_32 {dimension_numbers = #tpu.dot_dimension_numbers<[1], [0], [0], [1], [0, 0, 1, 1], [], []>} : vector<4x128xbf16>, vector<128x8xbf16>, vector<4x8xf32> -> vector<4x8xf32>
    %c0_33 = arith.constant 0 : index
    %c0_34 = arith.constant 0 : index
    %47 = vector.load %arg13[%c0_33, %c0_34] : memref<1x8xf32, #tpu.memory_space<vmem>>, vector<1x8xf32>
    %48 = vector.broadcast %47 : vector<1x8xf32> to vector<4x8xf32>
    %49 = arith.addf %46, %48 : vector<4x8xf32>
    %c0_35 = arith.constant 0 : index
    %c0_36 = arith.constant 0 : index
    %50 = vector.load %arg14[%c0_35, %c0_36] : memref<4x8xf32, #tpu.memory_space<vmem>>, vector<4x8xf32>
    tpu.vector_store %arg14[%c0_35, %c0_36], %49 {strides = array<i32>} : memref<4x8xf32, #tpu.memory_space<vmem>>, vector<4x8xf32>,
    return
  }
  func.func @transform_0(%arg0: i32) -> (i32, i32) {
    %c0_i32 = arith.constant 0 : i32
    %c0_i32_0 = arith.constant 0 : i32
    return %arg0, %c0_i32 : i32, i32
  }
  func.func @transform_1(%arg0: i32) -> (i32, i32) {
    %c0_i32 = arith.constant 0 : i32
    %c0_i32_0 = arith.constant 0 : i32
    %c0_i32_1 = arith.constant 0 : i32
    return %c0_i32, %c0_i32_0 : i32, i32
  }
  func.func @transform_2(%arg0: i32) -> (i32, i32) {
    %c0_i32 = arith.constant 0 : i32
    %c0_i32_0 = arith.constant 0 : i32
    %c0_i32_1 = arith.constant 0 : i32
    return %c0_i32, %c0_i32_0 : i32, i32
  }
  func.func @transform_3(%arg0: i32) -> (i32, i32) {
    %c0_i32 = arith.constant 0 : i32
    %c0_i32_0 = arith.constant 0 : i32
    %c0_i32_1 = arith.constant 0 : i32
    return %c0_i32, %c0_i32_0 : i32, i32
  }
  func.func @transform_4(%arg0: i32) -> (i32, i32) {
    %c0_i32 = arith.constant 0 : i32
    %c0_i32_0 = arith.constant 0 : i32
    %c0_i32_1 = arith.constant 0 : i32
    return %c0_i32, %c0_i32_0 : i32, i32
  }
  func.func @transform_5(%arg0: i32) -> (i32, i32) {
    %c0_i32 = arith.constant 0 : i32
    %c0_i32_0 = arith.constant 0 : i32
    %c0_i32_1 = arith.constant 0 : i32
    return %c0_i32, %c0_i32_0 : i32, i32
  }
  func.func @transform_6(%arg0: i32) -> (i32, i32) {
    %c0_i32 = arith.constant 0 : i32
    %c0_i32_0 = arith.constant 0 : i32
    %c0_i32_1 = arith.constant 0 : i32
    return %c0_i32, %c0_i32_0 : i32, i32
  }
  func.func @transform_7(%arg0: i32) -> (i32, i32) {
    %c0_i32 = arith.constant 0 : i32
    %c0_i32_0 = arith.constant 0 : i32
    %c0_i32_1 = arith.constant 0 : i32
    return %c0_i32, %c0_i32_0 : i32, i32
  }
  func.func @transform_8(%arg0: i32) -> (i32, i32) {
    %c0_i32 = arith.constant 0 : i32
    %c0_i32_0 = arith.constant 0 : i32
    %c0_i32_1 = arith.constant 0 : i32
    return %c0_i32, %c0_i32_0 : i32, i32
  }
  func.func @transform_9(%arg0: i32) -> (i32, i32) {
    %c0_i32 = arith.constant 0 : i32
    %c0_i32_0 = arith.constant 0 : i32
    %c0_i32_1 = arith.constant 0 : i32
    return %c0_i32, %c0_i32_0 : i32, i32
  }
  func.func @transform_10(%arg0: i32) -> (i32, i32) {
    %c0_i32 = arith.constant 0 : i32
    %c0_i32_0 = arith.constant 0 : i32
    %c0_i32_1 = arith.constant 0 : i32
    return %c0_i32, %c0_i32_0 : i32, i32
  }
  func.func @transform_11(%arg0: i32) -> (i32, i32) {
    %c0_i32 = arith.constant 0 : i32
    %c0_i32_0 = arith.constant 0 : i32
    %c0_i32_1 = arith.constant 0 : i32
    return %c0_i32, %c0_i32_0 : i32, i32
  }
  func.func @transform_12(%arg0: i32) -> (i32, i32) {
    %c0_i32 = arith.constant 0 : i32
    %c0_i32_0 = arith.constant 0 : i32
    %c0_i32_1 = arith.constant 0 : i32
    return %c0_i32, %c0_i32_0 : i32, i32
  }
  func.func @transform_13(%arg0: i32) -> (i32, i32) {
    %c0_i32 = arith.constant 0 : i32
    %c0_i32_0 = arith.constant 0 : i32
    return %arg0, %c0_i32 : i32, i32
  }
}

</mosaic_0001>

<bundles_post_ra>
// kernel: tpu_custom_call.1
= control target key start
LH: loop header
LB: loop body
LE: loop exit
PB: predicated region body
PF: predicated region fallthrough
CT: control target
= control target key end

     0   :  { %18 = vsyncpa [#allocation3], 0  ;;  %s3024_s0 = inlined_call_operand.vmem [shape: f32[4,10], index: 0, kind: input, shape index: {}]   ;;  %s3025_s1 = inlined_call_operand.vmem [shape: bf16[10,320], index: 1, kind: input, shape index: {}]   ;;  %s3026_s2 = inlined_call_operand.vmem [shape: f32[1,320], index: 2, kind: input, shape index: {}]   ;;  %s3027_s3 = inlined_call_operand.hbm [shape: bf16[320,640], index: 3, kind: input, shape index: {}]   ;;  %s3028_s4 = inlined_call_operand.vmem [shape: f32[1,640], index: 4, kind: input, shape index: {}]   ;;  %s3029_s5 = inlined_call_operand.vmem [shape: bf16[640,128], index: 5, kind: input, shape index: {}]   ;;  %s3030_s6 = inlined_call_operand.vmem [shape: f32[1,128], index: 6, kind: input, shape index: {}]   ;;  %s3031_s7 = inlined_call_operand.vmem [shape: bf16[128,192], index: 7, kind: input, shape index: {}]   ;;  %s3032_s8 = inlined_call_operand.vmem [shape: f32[1,192], index: 8, kind: input, shape index: {}]   ;;  %s3033_s9 = inlined_call_operand.vmem [shape: bf16[128,64], index: 9, kind: input, shape index: {}]   ;;  %s3034_s10 = inlined_call_operand.vmem [shape: f32[1,64], index: 10, kind: input, shape index: {}]   ;;  %s3035_s11 = inlined_call_operand.vmem [shape: bf16[128,8], index: 11, kind: input, shape index: {}]   ;;  %s3036_s12 = inlined_call_operand.vmem [shape: f32[1,8], index: 12, kind: input, shape index: {}]   ;;  %s3037_s13 = inlined_call_operand.hbm [shape: f32[4,8], index: 13, kind: output, shape index: {}]  }
   0x1   :  { %19 = vsyncpa [#allocation4], 0  ;;  %s2607_s25 = smov [#allocation2]  }
   0x2   :  { %s31_s26 = sshll.u32 %s2607_s25, 4  ;;  %s32_s26 = int_to_ptr.vmem [resolvable:$true] %s31_s26 }
   0x3   :  { %s2571_s27 = scalar_lea.vmem %s32_s26, 12800  ;;  %p2576_p1 = scmp.lt.s32.totalorder %s32_s26, %s32_s26 }
   0x4   :  { %p2572_p0 = scmp.ne.s32.totalorder %s32_s26, %s2571_s27  ;;  %p2577_p2 = scmp.lt.s32.totalorder %s2571_s27, %s2571_s27 }
   0x6   :  { %p2578_p3 = por %p2577_p2, %p2576_p1 }
   0x8   :  { %p2579_p4 = pnand %p2578_p3, %p2572_p0 }
   0xa   :  { %2582 = shalt.err (!%p2579_p4)
}
   0xb   :  { %s2608_s28 = smov 320   ;;  %s2609_s29 = smov 20  }
   0xc   :  { %37 = dma.hbm_to_vmem [thread:$0]  %s3027_s3, 12800, %s32_s26, [#allocation3], %s2608_s28, %s2608_s28, %s2609_s29  }
   0xd   :  { %2603 = dma.done.wait [#allocation3], 12800  }
   0xe   :  { %2604 = vsyncadd [#allocation3], 4294954496  ;;  %v2610_v0 = vmov 0   ;;  %vm100_vm0 = vcmask 1044480   ;;  %v60_v3 = vld [vmem:[%s3024_s0] sm:$0xf]  ;;  %v68_v51 = vlaneseq }
   0xf   :  { %142 = vmatprep.mubr.bf16.mxu1 %v2610_v0  ;;  %v2339_v1 = vld [vmem:[%s3025_s1 + $0x4] ss:$12 sps:$4 sm:$0x1f]   ;;  %v2341_v2 = vld [vmem:[%s3025_s1] ss:$12 sps:$4 sm:$0x1f]   ;;  %v61_v5 = vpack.c.bf16 %v60_v3, %v60_v3 }
  0x10   :  { %1972 = vmatprep.subr.msk.bf16.mxu1 %vm100_vm0, %v2339_v1  ;;  %v102_v4 = vsel %vm100_vm0, %v2341_v2, 0  ;;  %v2342_v6 = vld [vmem:[%s3025_s1 + $0x8] ss:$12 sps:$4 sm:$0x1f]   ;;  %v2343_v7 = vld [vmem:[#allocation2 + $0x11c] ss:$20 sps:$4 sm:$0xff]  }
  0x11   :  { %125 = vmatpush1.bf16.msra.mxu1 %v102_v4  ;;  %vm96_vm1 = vcmask 80896   ;;  %v2345_v8 = vld [vmem:[#allocation2 + $0x118] ss:$20 sps:$4 sm:$0xff]   ;;  %v2611_v9 = vmov 0.0   ;;  %v108_v10 = vsel %vm100_vm0, %v2342_v6, 0  ;;  %868 = vmatprep.subr.bf16.mxu0 %v2343_v7  ;;  %vm2612_vm2 = vmmov 0  }
  0x12   :  { %2253 = vmatprep.subr.bf16.mxu1 %v2611_v9  ;;  %v2346_v11 = vld [vmem:[#allocation2 + $0xf4] ss:$20 sps:$4 sm:$0xff]   ;;  %869 = vmatpush1.bf16.msra.mxu0 %v2345_v8  ;;  %v2348_v12 = vld [vmem:[#allocation2 + $0xf0] ss:$20 sps:$4 sm:$0xff]   ;;  %v2349_v13 = vld [vmem:[#allocation2 + $0xcc] ss:$20 sps:$4 sm:$0xff]  }
  0x13   :  { %870 = vmatprep.subr.bf16.mxu0 %v2346_v11  ;;  %v2351_v14 = vld [vmem:[#allocation2 + $0xc8] ss:$20 sps:$4 sm:$0xff]   ;;  %v2352_v15 = vld [vmem:[#allocation2 + $0xa4] ss:$20 sps:$4 sm:$0xff]   ;;  %v2354_v16 = vld [vmem:[#allocation2 + $0xa0] ss:$20 sps:$4 sm:$0xff]  }
  0x14   :  { %1973 = vmatmul.mubr.msk.bf16.vlgmr.msra.gmra.mxu1 %vm96_vm1, %v61_v5  ;;  %v2355_v17 = vld [vmem:[#allocation2 + $0x7c] ss:$20 sps:$4 sm:$0xff]   ;;  %v2357_v18 = vld [vmem:[#allocation2 + $0x78] ss:$20 sps:$4 sm:$0xff]   ;;  %v2358_v19 = vld [vmem:[#allocation2 + $0x54] ss:$20 sps:$4 sm:$0xff]  }
  0x15   :  { %2254 = vmatpush3.bf16.msra.mxu1 %v108_v10  ;;  %2255 = vmatprep.mubr.msk.bf16.mxu1 %vm2612_vm2, %v2611_v9  ;;  %v2360_v20 = vld [vmem:[#allocation2 + $0x50] ss:$20 sps:$4 sm:$0xff]   ;;  %v2385_v21 = vld [vmem:[#allocation2 + $0x2f8] ss:$20 sps:$4 sm:$0xff]   ;;  %v2363_v24 = vld [vmem:[#allocation2 + $0x28] ss:$20 sps:$4 sm:$0xff]  }
  0x16   :  { %871 = vmatpush1.bf16.msra.mxu0 %v2348_v12  ;;  %v2387_v22 = vld [vmem:[#allocation2 + $0x2fc] ss:$20 sps:$4 sm:$0xff]   ;;  %v2361_v23 = vld [vmem:[#allocation2 + $0x2c] ss:$20 sps:$4 sm:$0xff]   ;;  %v2364_v25 = vld [vmem:[#allocation2 + $0x4] ss:$20 sps:$4 sm:$0xff]  }
  0x17   :  { %872 = vmatprep.subr.bf16.mxu0 %v2349_v13  ;;  %917 = vmatprep.subr.bf16.mxu1 %v2387_v22  ;;  %v2366_v26 = vld [vmem:[#allocation2] ss:$20 sps:$4 sm:$0xff]   ;;  %v2367_v27 = vld [vmem:[#allocation2 + $0x25c] ss:$20 sps:$4 sm:$0xff]   ;;  %v2369_v28 = vld [vmem:[#allocation2 + $0x258] ss:$20 sps:$4 sm:$0xff]  }
  0x18   :  { %v2370_v29 = vld [vmem:[#allocation2 + $0x234] ss:$20 sps:$4 sm:$0xff]   ;;  %v2372_v30 = vld [vmem:[#allocation2 + $0x230] ss:$20 sps:$4 sm:$0xff]   ;;  %v2373_v31 = vld [vmem:[#allocation2 + $0x20c] ss:$20 sps:$4 sm:$0xff]  }
  0x19   :  { %v2375_v32 = vld [vmem:[#allocation2 + $0x208] ss:$20 sps:$4 sm:$0xff]   ;;  %v2376_v33 = vld [vmem:[#allocation2 + $0x1e4] ss:$20 sps:$4 sm:$0xff]   ;;  %v2378_v34 = vld [vmem:[#allocation2 + $0x1e0] ss:$20 sps:$4 sm:$0xff]  }
  0x1a   :  { %873 = vmatpush1.bf16.msra.mxu0 %v2351_v14  ;;  %v2379_v35 = vld [vmem:[#allocation2 + $0x1bc] ss:$20 sps:$4 sm:$0xff]   ;;  %v2381_v36 = vld [vmem:[#allocation2 + $0x1b8] ss:$20 sps:$4 sm:$0xff]   ;;  %v2382_v37 = vld [vmem:[#allocation2 + $0x194] ss:$20 sps:$4 sm:$0xff]  }
  0x1b   :  { %874 = vmatprep.subr.bf16.mxu0 %v2352_v15  ;;  %v2384_v38 = vld [vmem:[#allocation2 + $0x190] ss:$20 sps:$4 sm:$0xff]   ;;  %v2388_v39 = vld [vmem:[#allocation2 + $0x16c] ss:$20 sps:$4 sm:$0xff]   ;;  %v2390_v40 = vld [vmem:[#allocation2 + $0x168] ss:$20 sps:$4 sm:$0xff]  }
  0x1c   :  { %2256 = vmatmul.mubr.msk.bf16.vlgmr.msra.gmra.mxu1 %vm96_vm1, %v61_v5  ;;  %v2393_v41 = vld [vmem:[#allocation2 + $0x2d4] ss:$20 sps:$4 sm:$0xff]   ;;  %v2391_v42 = vld [vmem:[#allocation2 + $0x2d0] ss:$20 sps:$4 sm:$0xff]   ;;  %v2399_v45 = vld [vmem:[#allocation2 + $0x2ac] ss:$20 sps:$4 sm:$0xff]  }
  0x1d   :  { %941 = vmatprep.mubr.bf16.mxu1 %v2610_v0  ;;  %918 = vmatpush1.bf16.msra.mxu1 %v2385_v21  ;;  %v2394_v43 = vld [vmem:[#allocation2 + $0x144] ss:$20 sps:$4 sm:$0xff]   ;;  %v2396_v44 = vld [vmem:[#allocation2 + $0x140] ss:$20 sps:$4 sm:$0xff]   ;;  %v2397_v46 = vld [vmem:[#allocation2 + $0x2a8] ss:$20 sps:$4 sm:$0xff]  }
  0x1e   :  { %875 = vmatpush1.bf16.msra.mxu0 %v2354_v16  ;;  %919 = vmatprep.subr.bf16.mxu1 %v2393_v41  ;;  %v2402_v47 = vld [vmem:[#allocation2 + $0x304] ss:$20 sps:$4 sm:$0xff]   ;;  %v2403_v49 = vld [vmem:[#allocation2 + $0x280] ss:$20 sps:$4 sm:$0xff]   ;;  %v2707_v52 = vshrl.u32 %v68_v51, 7  ;;  %vm864_vm3 = vcmask 523264  }
  0x1f   :  { %876 = vmatprep.subr.bf16.mxu0 %v2355_v17  ;;  %v2405_v48 = vld [vmem:[#allocation2 + $0x284] ss:$20 sps:$4 sm:$0xff]   ;;  %v66_v54 = vld [vmem:[%s3026_s2] sm:$0x7]  ;;  %v2408_v10 = vld [vmem:[#allocation2 + $0x2dc] ss:$20 sps:$4 sm:$0xff]  }
  0x20   :  { %v2411_v50 = vld [vmem:[#allocation2 + $0x124] ss:$20 sps:$4 sm:$0xff]   ;;  %v2710_v53 = vsub.s32 0, %v2707_v52  ;;  %v2716_v55 = vsub.s32 1, %v2707_v52  ;;  %v78_v60 = vsub.s32 2, %v2707_v52  ;;  %s2613_s26 = smov 64  }
  0x21   :  { %920 = vmatpush1.bf16.msra.mxu1 %v2391_v42  ;;  %v2400_v6 = vld [vmem:[#allocation2 + $0x300] ss:$20 sps:$4 sm:$0xff]   ;;  %v2406_v14 = vld [vmem:[#allocation2 + $0x2d8] ss:$20 sps:$4 sm:$0xff]   ;;  %v2412_v21 = vld [vmem:[#allocation2 + $0x2b0] ss:$20 sps:$4 sm:$0xff]  }
  0x22   :  { %877 = vmatpush1.bf16.msra.mxu0 %v2357_v18  ;;  %921 = vmatprep.subr.bf16.mxu1 %v2399_v45  ;;  %v71_v56 = vrot.slane %v66_v54, %v2710_v53  ;;  %v75_v57 = vrot.slane %v66_v54, %v2716_v55  ;;  %v79_v3 = vrot.slane %v66_v54, %v78_v60  ;;  %v2409_v16 = vld [vmem:[#allocation2 + $0x120] ss:$20 sps:$4 sm:$0xff]   ;;  %v2415_v22 = vld [vmem:[#allocation2 + $0xf8] ss:$20 sps:$4 sm:$0xff]   ;;  %v2443_v41 = vld [vmem:[#allocation2 + $0xb0] ss:$20 sps:$4 sm:$0xff]  }
  0x23   :  { %878 = vmatprep.subr.bf16.mxu0 %v2358_v19  ;;  %v2414_v18 = vld [vmem:[#allocation2 + $0x2b4] ss:$20 sps:$4 sm:$0xff]   ;;  %v2417_v19 = vld [vmem:[#allocation2 + $0xfc] ss:$20 sps:$4 sm:$0xff]   ;;  %v2454_v51 = vld [vmem:[#allocation2 + $0x178] ss:$20 sps:$4 sm:$0xff]  }
  0x24   :  { %v2440_v42 = vld [vmem:[#allocation2 + $0x30] ss:$20 sps:$4 sm:$0xff]   ;;  %v2448_v45 = vld [vmem:[#allocation2 + $0x88] ss:$20 sps:$4 sm:$0xff]   ;;  %vm1952_vm4 = vcmask 60416  }
  0x25   :  { %922 = vmatpush1.bf16.msra.mxu1 %v2397_v46  ;;  %v2445_v46 = vld [vmem:[#allocation2 + $0x8] ss:$20 sps:$4 sm:$0xff]  }
  0x26   :  { %879 = vmatpush1.bf16.msra.mxu0 %v2360_v20  ;;  %923 = vmatprep.subr.bf16.mxu1 %v2405_v48  ;;  %v2452_v48 = vld [vmem:[#allocation2 + $0x264] ss:$20 sps:$4 sm:$0xff]   ;;  %v2457_v54 = vld [vmem:[#allocation2 + $0x23c] ss:$20 sps:$4 sm:$0xff]  }
  0x27   :  { %880 = vmatprep.subr.bf16.mxu0 %v2361_v23  ;;  %v2420_v23 = vld [vmem:[#allocation2 + $0x28c] ss:$20 sps:$4 sm:$0xff]  }
  0x29   :  { %924 = vmatpush1.bf16.msra.mxu1 %v2403_v49  ;;  %v2453_v49 = vld [vmem:[#allocation2 + $0x60] ss:$20 sps:$4 sm:$0xff]  }
  0x2a   :  { %881 = vmatpush1.bf16.msra.mxu0 %v2363_v24  ;;  %950 = vmatprep.subr.bf16.mxu1 %v2411_v50  ;;  %v2423_v24 = vld [vmem:[#allocation2 + $0xd4] ss:$20 sps:$4 sm:$0xff]  }
  0x2b   :  { %882 = vmatprep.subr.bf16.mxu0 %v2364_v25  ;;  %v2418_v25 = vld [vmem:[#allocation2 + $0x288] ss:$20 sps:$4 sm:$0xff]   ;;  %v2450_v50 = vld [vmem:[#allocation2 + $0x260] ss:$20 sps:$4 sm:$0xff]  }
  0x2e   :  { %883 = vmatpush1.bf16.msra.mxu0 %v2366_v26  ;;  %v2421_v26 = vld [vmem:[#allocation2 + $0xd0] ss:$20 sps:$4 sm:$0xff]  }
  0x2f   :  { %884 = vmatprep.subr.bf16.mxu0 %v2367_v27  ;;  %v2424_v27 = vld [vmem:[#allocation2 + $0x268] ss:$20 sps:$4 sm:$0xff]  }
  0x32   :  { %885 = vmatpush2.bf16.msra.mxu0 %v2369_v28  ;;  %v2427_v28 = vld [vmem:[#allocation2 + $0xac] ss:$20 sps:$4 sm:$0xff]  }
  0x33   :  { %886 = vmatprep.subr.bf16.mxu0 %v2370_v29  ;;  %v2428_v29 = vld [vmem:[#allocation2 + $0x128] ss:$20 sps:$4 sm:$0xff]  }
  0x36   :  { %887 = vmatpush2.bf16.msra.mxu0 %v2372_v30  ;;  %v2425_v30 = vld [vmem:[#allocation2 + $0xa8] ss:$20 sps:$4 sm:$0xff]  }
  0x37   :  { %888 = vmatprep.subr.bf16.mxu0 %v2373_v31  ;;  %v2429_v31 = vld [vmem:[#allocation2 + $0x240] ss:$20 sps:$4 sm:$0xff]  }
  0x3a   :  { %889 = vmatpush2.bf16.msra.mxu0 %v2375_v32  ;;  %v2432_v32 = vld [vmem:[#allocation2 + $0x84] ss:$20 sps:$4 sm:$0xff]  }
  0x3b   :  { %890 = vmatprep.subr.bf16.mxu0 %v2376_v33  ;;  %v2433_v33 = vld [vmem:[#allocation2 + $0x100] ss:$20 sps:$4 sm:$0xff]  }
  0x3e   :  { %891 = vmatpush2.bf16.msra.mxu0 %v2378_v34  ;;  %v2430_v34 = vld [vmem:[#allocation2 + $0x80] ss:$20 sps:$4 sm:$0xff]  }
  0x3f   :  { %892 = vmatprep.subr.bf16.mxu0 %v2379_v35  ;;  %v2434_v35 = vld [vmem:[#allocation2 + $0x218] ss:$20 sps:$4 sm:$0xff]  }
  0x42   :  { %893 = vmatpush2.bf16.msra.mxu0 %v2381_v36  ;;  %v2437_v36 = vld [vmem:[#allocation2 + $0x5c] ss:$20 sps:$4 sm:$0xff]  }
  0x43   :  { %894 = vmatprep.subr.bf16.mxu0 %v2382_v37  ;;  %v2438_v37 = vld [vmem:[#allocation2 + $0xd8] ss:$20 sps:$4 sm:$0xff]  }
  0x46   :  { %895 = vmatpush2.bf16.msra.mxu0 %v2384_v38  ;;  %v2435_v38 = vld [vmem:[#allocation2 + $0x58] ss:$20 sps:$4 sm:$0xff]  }
  0x47   :  { %896 = vmatprep.subr.bf16.mxu0 %v2388_v39  ;;  %v2439_v39 = vld [vmem:[#allocation2 + $0x1f0] ss:$20 sps:$4 sm:$0xff]  }
  0x4a   :  { %897 = vmatpush2.bf16.msra.mxu0 %v2390_v40  ;;  %v2442_v40 = vld [vmem:[#allocation2 + $0x34] ss:$20 sps:$4 sm:$0xff]  }
  0x4b   :  { %898 = vmatprep.subr.bf16.mxu0 %v2394_v43  ;;  %v2444_v43 = vld [vmem:[#allocation2 + $0x1c8] ss:$20 sps:$4 sm:$0xff]  }
  0x4e   :  { %899 = vmatpush2.bf16.msra.mxu0 %v2396_v44  ;;  %v2447_v44 = vld [vmem:[#allocation2 + $0xc] ss:$20 sps:$4 sm:$0xff]  }
  0x4f   :  { %999 = vmatprep.subr.bf16.mxu0 %v2402_v47  ;;  %v2449_v47 = vld [vmem:[#allocation2 + $0x1a0] ss:$20 sps:$4 sm:$0xff]  }
  0xd4   :  { %v144_v58 = vpop.f32.mrf.mxu1 }
  0xd5   :  { %v145_v59 = vadd.f32 %v144_v58, %v71_v56  ;;  %v2458_v56 = vld [vmem:[#allocation2 + $0x38] ss:$20 sps:$4 sm:$0xff]   ;;  %v2459_v58 = vld [vmem:[#allocation2 + $0x150] ss:$20 sps:$4 sm:$0xff]  }
  0xd6   :  { %v146_v61 = vpop.f32.mrf.mxu1 }
  0xd7   :  { %v147_v62 = vadd.f32 %v146_v61, %v75_v57  ;;  %v191_v63 = vmax.f32 %v145_v59, 0.0  ;;  %v2455_v57 = vld [vmem:[#allocation2 + $0x238] ss:$20 sps:$4 sm:$0xff]   ;;  %v2462_v59 = vld [vmem:[#allocation2 + $0x214] ss:$20 sps:$4 sm:$0xff]  }
  0xd8   :  { %v148_v1 = vpop.f32.mrf.mxu1  ;;  %v2463_v61 = vld [vmem:[#allocation2 + $0x10] ss:$20 sps:$4 sm:$0xff]  }
  0xd9   :  { %v192_v2 = vmax.f32 %v147_v62, 0.0  ;;  %v2723_v7 = vpack.c.bf16 %v191_v63, %v191_v63  ;;  %v2460_v62 = vld [vmem:[#allocation2 + $0x210] ss:$20 sps:$4 sm:$0xff]   ;;  %v2466_v63 = vld [vmem:[#allocation2 + $0x1ec] ss:$20 sps:$4 sm:$0xff]  }
  0xda   :  { %v149_v4 = vpop.f32.mrf.mxu1  ;;  %v2464_v1 = vld [vmem:[#allocation2 + $0x1e8] ss:$20 sps:$4 sm:$0xff]  }
  0xdb   :  { %v195_v5 = vpack.c.bf16 %v192_v2, %v192_v2  ;;  %v2469_v2 = vld [vmem:[#allocation2 + $0x1c4] ss:$20 sps:$4 sm:$0xff]   ;;  %v2472_v4 = vld [vmem:[#allocation2 + $0x19c] ss:$20 sps:$4 sm:$0xff]  }
  0xdc   :  { %v185_v8 = vpop.f32.mrf.mxu1 }
  0xdd   :  { %v186_v11 = vadd.f32 %v185_v8, %v79_v3  ;;  %900 = vmatprep.mubr.bf16.mxu0 %v195_v5  ;;  %v2467_v3 = vld [vmem:[#allocation2 + $0x1c0] ss:$20 sps:$4 sm:$0xff]   ;;  %v2473_v8 = vld [vmem:[#allocation2 + $0x170] ss:$20 sps:$4 sm:$0xff]  }
  0xde   :  { %v2257_v12 = vpop.f32.mrf.mxu1  ;;  %901 = vmatmul.mubr.bf16.vlgmr.msra.gmra.mxu0 %v2723_v7 }
  0xdf   :  { %v193_v13 = vmax.f32 %v186_v11, 0.0  ;;  %1000 = vmatpush1.bf16.msra.mxu0 %v2400_v6  ;;  %1023 = vmatprep.mubr.bf16.mxu0 %v2610_v0  ;;  %v2475_v6 = vld [vmem:[#allocation2 + $0x174] ss:$20 sps:$4 sm:$0xff]  }
  0xe0   :  { %v188_v15 = vpop.f32.mrf.mxu1  ;;  %1001 = vmatprep.subr.bf16.mxu0 %v2408_v10  ;;  %v2478_v10 = vld [vmem:[#allocation2 + $0x14c] ss:$20 sps:$4 sm:$0xff]   ;;  %v2476_v11 = vld [vmem:[#allocation2 + $0x148] ss:$20 sps:$4 sm:$0xff]  }
  0xe1   :  { %v2727_v17 = vpack.c.bf16 %v193_v13, %v193_v13  ;;  %v2479_v12 = vld [vmem:[#allocation2 + $0x308] ss:$20 sps:$4 sm:$0xff]   ;;  %v2480_v13 = vld [vmem:[#allocation2 + $0x2e0] ss:$20 sps:$4 sm:$0xff]   ;;  %v2482_v15 = vld [vmem:[#allocation2 + $0x290] ss:$20 sps:$4 sm:$0xff]  }
  0xe2   :  { %v2258_v20 = vpop.f32.mrf.mxu1 }
  0xe3   :  { %1002 = vmatpush1.bf16.msra.mxu0 %v2406_v14  ;;  %2075 = vmatmul.mubr.msk.bf16.vlgmr.msra.gmra.mxu1 %vm864_vm3, %v2727_v17  ;;  %v2481_v14 = vld [vmem:[#allocation2 + $0x2b8] ss:$20 sps:$4 sm:$0xff]  }
  0xe4   :  { %951 = vmatpush1.bf16.msra.mxu1 %v2409_v16  ;;  %982 = vmatprep.mubr.bf16.mxu1 %v195_v5  ;;  %v2483_v16 = vld [vmem:[%s3029_s5 + $0x78] sm:$0xff]   ;;  %v2487_v20 = vld [vmem:[%s3029_s5 + $0x68] sm:$0xff]  }
  0xe5   :  { %1003 = vmatprep.subr.bf16.mxu0 %v2414_v18  ;;  %952 = vmatprep.subr.bf16.mxu1 %v2417_v19  ;;  %v2485_v18 = vld [vmem:[%s3029_s5 + $0x70] sm:$0xff]  }
  0xe6   :  { %v2486_v19 = vld [vmem:[%s3029_s5 + $0x30] sm:$0xff]  }
  0xe7   :  { %1004 = vmatpush1.bf16.msra.mxu0 %v2412_v21  ;;  %v2488_v21 = vld [vmem:[%s3029_s5 + $0x28] sm:$0xff]  }
  0xe8   :  { %953 = vmatpush1.bf16.msra.mxu1 %v2415_v22  ;;  %1005 = vmatprep.subr.bf16.mxu0 %v2420_v23  ;;  %v2490_v22 = vld [vmem:[%s3029_s5 + $0x20] sm:$0xff]   ;;  %v2491_v23 = vld [vmem:[%s3029_s5 + $0x58] sm:$0xff]  }
  0xe9   :  { %954 = vmatprep.subr.bf16.mxu1 %v2423_v24  ;;  %v2492_v24 = vld [vmem:[%s3029_s5 + $0x18] sm:$0xff]  }
  0xeb   :  { %1006 = vmatpush1.bf16.msra.mxu0 %v2418_v25  ;;  %v2493_v25 = vld [vmem:[%s3029_s5 + $0x50] sm:$0xff]  }
  0xec   :  { %955 = vmatpush1.bf16.msra.mxu1 %v2421_v26  ;;  %2155 = vmatprep.subr.bf16.mxu0 %v2424_v27  ;;  %v2494_v26 = vld [vmem:[%s3029_s5 + $0x10] sm:$0xff]   ;;  %v2495_v27 = vld [vmem:[%s3029_s5 + $0x48] sm:$0xff]  }
  0xed   :  { %956 = vmatprep.subr.bf16.mxu1 %v2427_v28  ;;  %v2496_v28 = vld [vmem:[%s3029_s5 + $0x8] sm:$0xff]  }
  0xee   :  { %2076 = vmatmul.mubr.msk.bf16.vlgmr.msra.gmra.mxu0 %vm864_vm3, %v2727_v17 }
  0xef   :  { %2156 = vmatpush3.bf16.msra.mxu0 %v2428_v29  ;;  %1064 = vmatprep.mubr.bf16.mxu0 %v195_v5  ;;  %v2470_v5 = vld [vmem:[#allocation2 + $0x198] ss:$20 sps:$4 sm:$0xff]   ;;  %v2497_v29 = vld [vmem:[%s3029_s5 + $0x40] sm:$0xff]  }
  0xf0   :  { %957 = vmatpush1.bf16.msra.mxu1 %v2425_v30  ;;  %2157 = vmatprep.subr.bf16.mxu0 %v2429_v31  ;;  %v2498_v30 = vld [vmem:[%s3029_s5] sm:$0xff]   ;;  %v2499_v31 = vld [vmem:[%s3029_s5 + $0xf8] sm:$0xff]  }
  0xf1   :  { %958 = vmatprep.subr.bf16.mxu1 %v2432_v32  ;;  %v2500_v32 = vld [vmem:[%s3029_s5 + $0xb8] sm:$0xff]  }
  0xf3   :  { %2158 = vmatpush3.bf16.msra.mxu0 %v2433_v33  ;;  %v2501_v33 = vld [vmem:[%s3029_s5 + $0xf0] sm:$0xff]  }
  0xf4   :  { %959 = vmatpush1.bf16.msra.mxu1 %v2430_v34  ;;  %2159 = vmatprep.subr.bf16.mxu0 %v2434_v35  ;;  %v2502_v34 = vld [vmem:[%s3029_s5 + $0xb0] sm:$0xff]   ;;  %v2503_v35 = vld [vmem:[%s3029_s5 + $0xe8] sm:$0xff]  }
  0xf5   :  { %960 = vmatprep.subr.bf16.mxu1 %v2437_v36  ;;  %v2504_v36 = vld [vmem:[%s3029_s5 + $0xa8] sm:$0xff]  }
  0xf7   :  { %2160 = vmatpush3.bf16.msra.mxu0 %v2438_v37  ;;  %v2505_v37 = vld [vmem:[%s3029_s5 + $0xe0] sm:$0xff]  }
  0xf8   :  { %961 = vmatpush1.bf16.msra.mxu1 %v2435_v38  ;;  %2161 = vmatprep.subr.bf16.mxu0 %v2439_v39  ;;  %v2507_v38 = vld [vmem:[%s3029_s5 + $0xa0] sm:$0xff]   ;;  %v2508_v39 = vld [vmem:[%s3029_s5 + $0xd8] sm:$0xff]  }
  0xf9   :  { %962 = vmatprep.subr.bf16.mxu1 %v2442_v40  ;;  %v2510_v40 = vld [vmem:[%s3029_s5 + $0x98] sm:$0xff]  }
  0xfb   :  { %2162 = vmatpush3.bf16.msra.mxu0 %v2443_v41  ;;  %v2511_v41 = vld [vmem:[%s3029_s5 + $0xd0] sm:$0xff]  }
  0xfc   :  { %963 = vmatpush1.bf16.msra.mxu1 %v2440_v42  ;;  %2163 = vmatprep.subr.bf16.mxu0 %v2444_v43  ;;  %v2513_v42 = vld [vmem:[%s3029_s5 + $0x90] sm:$0xff]   ;;  %v2514_v43 = vld [vmem:[%s3029_s5 + $0xc8] sm:$0xff]  }
  0xfd   :  { %964 = vmatprep.subr.bf16.mxu1 %v2447_v44  ;;  %v2516_v44 = vld [vmem:[%s3029_s5 + $0x88] sm:$0xff]  }
  0xff   :  { %2164 = vmatpush3.bf16.msra.mxu0 %v2448_v45  ;;  %v2517_v45 = vld [vmem:[%s3029_s5 + $0xc0] sm:$0xff]  }
 0x100   :  { %965 = vmatpush1.bf16.msra.mxu1 %v2445_v46  ;;  %2165 = vmatprep.subr.bf16.mxu0 %v2449_v47  ;;  %v2519_v46 = vld [vmem:[%s3029_s5 + $0x80] sm:$0xff]  }
 0x101   :  { %966 = vmatprep.subr.bf16.mxu1 %v2452_v48  ;;  %v2843_v47 = vld [vmem:[%s3028_s4] sm:$0x1f] }
 0x102   :  { %v322_v48 = vrot.slane %v2843_v47, %v2710_v53 }
 0x103   :  { %2166 = vmatpush3.bf16.msra.mxu0 %v2453_v49 }
 0x104   :  { %967 = vmatpush2.bf16.msra.mxu1 %v2450_v50  ;;  %2167 = vmatprep.subr.bf16.mxu0 %v2454_v51  ;;  %v326_v50 = vrot.slane %v2843_v47, %v2716_v55 }
 0x105   :  { %968 = vmatprep.subr.bf16.mxu1 %v2457_v54 }
 0x107   :  { %2168 = vmatpush3.bf16.msra.mxu0 %v2458_v56 }
 0x108   :  { %969 = vmatpush2.bf16.msra.mxu1 %v2455_v57  ;;  %2169 = vmatprep.subr.bf16.mxu0 %v2459_v58 }
 0x109   :  { %970 = vmatprep.subr.bf16.mxu1 %v2462_v59 }
 0x10b   :  { %2170 = vmatpush3.bf16.msra.mxu0 %v2463_v61 }
 0x10c   :  { %971 = vmatpush2.bf16.msra.mxu1 %v2460_v62  ;;  %2204 = vmatprep.subr.bf16.mxu0 %v2499_v31 }
 0x10d   :  { %972 = vmatprep.subr.bf16.mxu1 %v2466_v63 }
 0x10e   :  { %1065 = vmatmul.mubr.bf16.vlgmr.msra.gmra.mxu0 %v2723_v7 }
 0x10f   :  { %2205 = vmatpush3.bf16.msra.mxu0 %v2500_v32 }
 0x110   :  { %973 = vmatpush2.bf16.msra.mxu1 %v2464_v1  ;;  %2206 = vmatprep.subr.bf16.mxu0 %v2501_v33 }
 0x111   :  { %974 = vmatprep.subr.bf16.mxu1 %v2469_v2 }
 0x113   :  { %2207 = vmatpush3.bf16.msra.mxu0 %v2502_v34 }
 0x114   :  { %975 = vmatpush2.bf16.msra.mxu1 %v2467_v3  ;;  %2208 = vmatprep.subr.bf16.mxu0 %v2503_v35 }
 0x115   :  { %976 = vmatprep.subr.bf16.mxu1 %v2472_v4 }
 0x117   :  { %2209 = vmatpush3.bf16.msra.mxu0 %v2504_v36 }
 0x118   :  { %977 = vmatpush2.bf16.msra.mxu1 %v2470_v5  ;;  %2210 = vmatprep.subr.bf16.mxu0 %v2505_v37  ;;  %v337_v37 = vsub.s32 4, %v2707_v52 }
 0x119   :  { %978 = vmatprep.subr.bf16.mxu1 %v2475_v6  ;;  %v2506_v6 = vld [vmem:[%s3029_s5 + $0x138] sm:$0xff]  }
 0x11b   :  { %2211 = vmatpush3.bf16.msra.mxu0 %v2507_v38 }
 0x11c   :  { %979 = vmatpush2.bf16.msra.mxu1 %v2473_v8  ;;  %2212 = vmatprep.subr.bf16.mxu0 %v2508_v39 }
 0x11d   :  { %980 = vmatprep.subr.bf16.mxu1 %v2478_v10 }
 0x11f   :  { %2213 = vmatpush3.bf16.msra.mxu0 %v2510_v40 }
 0x120   :  { %981 = vmatpush2.bf16.msra.mxu1 %v2476_v11  ;;  %2214 = vmatprep.subr.bf16.mxu0 %v2511_v41  ;;  %v2509_v11 = vld [vmem:[%s3029_s5 + $0x130] sm:$0xff]  }
 0x121   :  { %2259 = vmatprep.subr.bf16.mxu1 %v2611_v9 }
 0x123   :  { %983 = vmatmul.mubr.bf16.vlgmr.msra.gmra.mxu1 %v2723_v7  ;;  %v2484_v7 = vld [vmem:[%s3029_s5 + $0x38] sm:$0xff]   ;;  %2215 = vmatpush3.bf16.msra.mxu0 %v2513_v42 }
 0x124   :  { %2260 = vmatpush3.bf16.msra.mxu1 %v2479_v12  ;;  %2267 = vmatprep.mubr.msk.bf16.mxu1 %vm2612_vm2, %v2611_v9 }
 0x125   :  { %2261 = vmatprep.subr.bf16.mxu1 %v2611_v9  ;;  %2216 = vmatprep.subr.bf16.mxu0 %v2514_v43  ;;  %v2523_v43 = vld [vmem:[%s3031_s7 + $0x70] ss:$8 sps:$4 sm:$0xff]  }
 0x127   :  { %2217 = vmatpush3.bf16.msra.mxu0 %v2516_v44  ;;  %v2525_v44 = vld [vmem:[%s3031_s7 + $0x74] ss:$8 sps:$4 sm:$0xff]  }
 0x128   :  { %2262 = vmatpush3.bf16.msra.mxu1 %v2480_v13  ;;  %2218 = vmatprep.subr.bf16.mxu0 %v2517_v45  ;;  %v2528_v45 = vld [vmem:[%s3031_s7 + $0x64] ss:$8 sps:$4 sm:$0xff]  }
 0x129   :  { %2263 = vmatprep.subr.bf16.mxu1 %v2611_v9 }
 0x12b   :  { %2219 = vmatpush3.bf16.msra.mxu0 %v2519_v46 }
 0x12c   :  { %2264 = vmatpush3.bf16.msra.mxu1 %v2481_v14  ;;  %v2512_v14 = vld [vmem:[%s3029_s5 + $0x128] sm:$0xff]   ;;  %1679 = vmatprep.subr.bf16.mxu0 %v2525_v44 }
 0x12d   :  { %2265 = vmatprep.subr.bf16.mxu1 %v2611_v9 }
 0x130   :  { %2266 = vmatpush3.bf16.msra.mxu1 %v2482_v15 }
 0x131   :  { %2182 = vmatprep.subr.bf16.mxu1 %v2483_v16  ;;  %v2515_v16 = vld [vmem:[%s3029_s5 + $0x120] sm:$0xff]  }
 0x133   :  { %2268 = vmatmul.mubr.msk.bf16.vlgmr.msra.gmra.mxu1 %vm864_vm3, %v2727_v17  ;;  %v2489_v17 = vld [vmem:[%s3029_s5 + $0x60] sm:$0xff]  }
 0x134   :  { %2183 = vmatpush3.bf16.msra.mxu1 %v2484_v7  ;;  %v2518_v7 = vld [vmem:[%s3029_s5 + $0x118] sm:$0xff]  }
 0x135   :  { %2184 = vmatprep.subr.bf16.mxu1 %v2485_v18  ;;  %v2520_v18 = vld [vmem:[%s3029_s5 + $0x110] sm:$0xff]  }
 0x138   :  { %2185 = vmatpush3.bf16.msra.mxu1 %v2486_v19  ;;  %v2521_v19 = vld [vmem:[%s3029_s5 + $0x108] sm:$0xff]  }
 0x139   :  { %2186 = vmatprep.subr.bf16.mxu1 %v2487_v20  ;;  %v2522_v20 = vld [vmem:[%s3029_s5 + $0x100] sm:$0xff]  }
 0x13c   :  { %2187 = vmatpush3.bf16.msra.mxu1 %v2488_v21 }
 0x13d   :  { %2188 = vmatprep.subr.bf16.mxu1 %v2489_v17 }
 0x140   :  { %2189 = vmatpush3.bf16.msra.mxu1 %v2490_v22 }
 0x141   :  { %2190 = vmatprep.subr.bf16.mxu1 %v2491_v23 }
 0x144   :  { %2191 = vmatpush3.bf16.msra.mxu1 %v2492_v24  ;;  %v333_v24 = vsub.s32 3, %v2707_v52 }
 0x145   :  { %2192 = vmatprep.subr.bf16.mxu1 %v2493_v25  ;;  %v330_v25 = vrot.slane %v2843_v47, %v78_v60  ;;  %v338_v60 = vrot.slane %v2843_v47, %v337_v37 }
 0x148   :  { %2193 = vmatpush3.bf16.msra.mxu1 %v2494_v26  ;;  %v334_v26 = vrot.slane %v2843_v47, %v333_v24 }
 0x149   :  { %2194 = vmatprep.subr.bf16.mxu1 %v2495_v27 }
 0x14c   :  { %2195 = vmatpush3.bf16.msra.mxu1 %v2496_v28 }
 0x14d   :  { %2196 = vmatprep.subr.bf16.mxu1 %v2497_v29 }
 0x150   :  { %2197 = vmatpush3.bf16.msra.mxu1 %v2498_v30 }
 0x151   :  { %2271 = vmatprep.subr.bf16.mxu1 %v2611_v9 }
 0x19e   :  { %v902_v49 = vpop.f32.mrf.mxu0 }
 0x19f   :  { %v903_v54 = vadd.f32 %v902_v49, %v322_v48  ;;  %v2531_v49 = vld [vmem:[%s3031_s7 + $0x54] ss:$8 sps:$4 sm:$0xff]  }
 0x1a0   :  { %v904_v51 = vpop.f32.mrf.mxu0 }
 0x1a1   :  { %v905_v58 = vadd.f32 %v904_v51, %v326_v50 }
 0x1a2   :  { %v906_v56 = vpop.f32.mrf.mxu0 }
 0x1a3   :  { %v943_v57 = vpop.f32.mrf.mxu1  ;;  %v2534_v56 = vld [vmem:[%s3031_s7 + $0x44] ss:$8 sps:$4 sm:$0xff]  }
 0x1a4   :  { %v944_v59 = vadd.f32 %v943_v57, %v903_v54  ;;  %v907_v61 = vpop.f32.mrf.mxu0  ;;  %v2529_v54 = vld [vmem:[%s3031_s7 + $0x50] ss:$8 sps:$4 sm:$0xff]   ;;  %v2532_v57 = vld [vmem:[%s3031_s7 + $0x40] ss:$8 sps:$4 sm:$0xff]  }
 0x1a5   :  { %v945_v62 = vpop.f32.mrf.mxu1  ;;  %v2540_v61 = vld [vmem:[%s3031_s7 + $0x24] ss:$8 sps:$4 sm:$0xff]  }
 0x1a6   :  { %v946_v63 = vadd.f32 %v945_v62, %v905_v58  ;;  %v1112_v1 = vmax.f32 %v944_v59, 0.0  ;;  %v2537_v58 = vld [vmem:[%s3031_s7 + $0x34] ss:$8 sps:$4 sm:$0xff]   ;;  %v2535_v59 = vld [vmem:[%s3031_s7 + $0x30] ss:$8 sps:$4 sm:$0xff]  }
 0x1a7   :  { %v947_v2 = vpop.f32.mrf.mxu1  ;;  %v2538_v62 = vld [vmem:[%s3031_s7 + $0x20] ss:$8 sps:$4 sm:$0xff]  }
 0x1a8   :  { %v1113_v3 = vmax.f32 %v946_v63, 0.0  ;;  %v1117_v8 = vpack.c.bf16 %v1112_v1, %v1112_v1  ;;  %v2543_v63 = vld [vmem:[%s3031_s7 + $0x14] ss:$8 sps:$4 sm:$0xff]   ;;  %v2541_v1 = vld [vmem:[%s3031_s7 + $0x10] ss:$8 sps:$4 sm:$0xff]  }
 0x1a9   :  { %v948_v4 = vpop.f32.mrf.mxu1  ;;  %v2546_v2 = vld [vmem:[%s3031_s7 + $0x4] ss:$8 sps:$4 sm:$0xff]  }
 0x1aa   :  { %v1118_v5 = vpack.c.bf16 %v1113_v3, %v1113_v3  ;;  %v2544_v3 = vld [vmem:[%s3031_s7] ss:$8 sps:$4 sm:$0xff]   ;;  %v2547_v4 = vld [vmem:[%s3033_s9 + $0x38] sm:$0xff]  }
 0x1ac   :  { %1481 = vmatprep.mubr.bf16.mxu1 %v1118_v5  ;;  %v2548_v5 = vld [vmem:[%s3033_s9 + $0x30] sm:$0xff]  }
 0x1ad   :  { %1482 = vmatmul.mubr.bf16.vlgmr.msra.gmra.mxu1 %v1117_v8  ;;  %v2550_v8 = vld [vmem:[%s3033_s9 + $0x20] sm:$0xff]  }
 0x1ae   :  { %v1025_v10 = vpop.f32.mrf.mxu0  ;;  %2272 = vmatpush3.bf16.msra.mxu1 %v2506_v6  ;;  %2287 = vmatprep.mubr.msk.bf16.mxu1 %vm2612_vm2, %v2611_v9  ;;  %v2549_v6 = vld [vmem:[%s3033_s9 + $0x28] sm:$0xff]  }
 0x1af   :  { %2273 = vmatprep.subr.bf16.mxu1 %v2611_v9 }
 0x1b0   :  { %v1027_v12 = vpop.f32.mrf.mxu0 }
 0x1b2   :  { %v1029_v13 = vpop.f32.mrf.mxu0  ;;  %2274 = vmatpush3.bf16.msra.mxu1 %v2509_v11  ;;  %v2552_v11 = vld [vmem:[%s3033_s9 + $0x10] sm:$0xff]  }
 0x1b3   :  { %2275 = vmatprep.subr.bf16.mxu1 %v2611_v9 }
 0x1b4   :  { %v1030_v15 = vpop.f32.mrf.mxu0 }
 0x1b6   :  { %2276 = vmatpush3.bf16.msra.mxu1 %v2512_v14 }
 0x1b7   :  { %2277 = vmatprep.subr.bf16.mxu1 %v2611_v9 }
 0x1ba   :  { %2278 = vmatpush3.bf16.msra.mxu1 %v2515_v16 }
 0x1bb   :  { %2279 = vmatprep.subr.bf16.mxu1 %v2611_v9 }
 0x1be   :  { %2280 = vmatpush3.bf16.msra.mxu1 %v2518_v7 }
 0x1bf   :  { %2281 = vmatprep.subr.bf16.mxu1 %v2611_v9 }
 0x1c2   :  { %2282 = vmatpush3.bf16.msra.mxu1 %v2520_v18 }
 0x1c3   :  { %2283 = vmatprep.subr.bf16.mxu1 %v2611_v9 }
 0x1c6   :  { %2284 = vmatpush3.bf16.msra.mxu1 %v2521_v19 }
 0x1c7   :  { %2285 = vmatprep.subr.bf16.mxu1 %v2611_v9 }
 0x1ca   :  { %2286 = vmatpush3.bf16.msra.mxu1 %v2522_v20  ;;  %v2078_v20 = vld [vmem:[%s3030_s6] ss:$0 sm:$0xff] }
 0x1cb   :  { %2291 = vmatprep.subr.bf16.mxu1 %v2611_v9 }
 0x1ce   :  { %v2171_v21 = vpop.f32.mrf.mxu0 }
 0x1d0   :  { %v2172_v17 = vpop.f32.mrf.mxu0 }
 0x1d1   :  { %v2173_v40 = vadd.f32 %v2172_v17, %v2171_v21 }
 0x1d2   :  { %v2174_v22 = vpop.f32.mrf.mxu0 }
 0x1d3   :  { %v1067_v41 = vadd.f32 %v2173_v40, %v338_v60 }
 0x1d4   :  { %v2175_v23 = vpop.f32.mrf.mxu0 }
 0x1e3   :  { %v984_v27 = vpop.f32.mrf.mxu1 }
 0x1e4   :  { %v985_v28 = vadd.f32 %v984_v27, %v330_v25 }
 0x1e5   :  { %v986_v29 = vpop.f32.mrf.mxu1 }
 0x1e6   :  { %v1026_v30 = vadd.f32 %v1025_v10, %v985_v28  ;;  %v987_v31 = vadd.f32 %v986_v29, %v334_v26  ;;  %v2551_v10 = vld [vmem:[%s3033_s9 + $0x18] sm:$0xff]  }
 0x1e7   :  { %v988_v32 = vpop.f32.mrf.mxu1 }
 0x1e8   :  { %v1028_v33 = vadd.f32 %v1027_v12, %v987_v31  ;;  %v1114_v34 = vmax.f32 %v1026_v30, 0.0  ;;  %v2553_v31 = vld [vmem:[%s3033_s9 + $0x8] sm:$0xff]   ;;  %v2554_v32 = vld [vmem:[%s3033_s9] sm:$0xff]  }
 0x1e9   :  { %v989_v35 = vpop.f32.mrf.mxu1 }
 0x1ea   :  { %v1115_v36 = vmax.f32 %v1028_v33, 0.0  ;;  %v1119_v39 = vpack.c.bf16 %v1114_v34, %v1114_v34  ;;  %v2555_v33 = vld [vmem:[%s3035_s11 + $0x38] sm:$0xff]   ;;  %v1587_v34 = vld [vmem:[%s3032_s8] sm:$0x3]  ;;  %v2556_v35 = vld [vmem:[%s3035_s11 + $0x30] sm:$0xff]  }
 0x1eb   :  { %v1596_v37 = vrot.slane %v1587_v34, %v2716_v55 }
 0x1ec   :  { %v1120_v38 = vpack.c.bf16 %v1115_v36, %v1115_v36  ;;  %v1592_v36 = vrot.slane %v1587_v34, %v2710_v53  ;;  %v2558_v53 = vld [vmem:[%s3035_s11 + $0x20] sm:$0xff]  }
 0x1ee   :  { %1521 = vmatprep.mubr.bf16.mxu0 %v1120_v38  ;;  %v2557_v38 = vld [vmem:[%s3035_s11 + $0x28] sm:$0xff]  }
 0x1ef   :  { %1522 = vmatmul.mubr.bf16.vlgmr.msra.gmra.mxu0 %v1119_v39 }
 0x1f0   :  { %1711 = vmatprep.mubr.bf16.mxu0 %v2610_v0  ;;  %1680 = vmatpush1.bf16.msra.mxu0 %v2523_v43  ;;  %v2526_v0 = vld [vmem:[%s3031_s7 + $0x60] ss:$8 sps:$4 sm:$0xff]  }
 0x1f1   :  { %1681 = vmatprep.subr.bf16.mxu0 %v2528_v45  ;;  %v2559_v45 = vld [vmem:[%s3035_s11 + $0x18] sm:$0xff]  }
 0x1f3   :  { %v1106_v42 = vpop.f32.mrf.mxu1 }
 0x1f4   :  { %v1107_v52 = vadd.f32 %v1106_v42, %v1067_v41  ;;  %1682 = vmatpush1.bf16.msra.mxu0 %v2526_v0  ;;  %v2562_v0 = vld [vmem:[%s3035_s11] sm:$0xff]  }
 0x1f5   :  { %v2269_v46 = vpop.f32.mrf.mxu1  ;;  %1683 = vmatprep.subr.bf16.mxu0 %v2531_v49 }
 0x1f6   :  { %v1116_v47 = vmax.f32 %v1107_v52, 0.0  ;;  %v2560_v46 = vld [vmem:[%s3035_s11 + $0x10] sm:$0xff]  }
 0x1f7   :  { %v1109_v48 = vpop.f32.mrf.mxu1 }
 0x1f8   :  { %v1121_v50 = vpack.c.bf16 %v1116_v47, %v1116_v47  ;;  %1684 = vmatpush1.bf16.msra.mxu0 %v2529_v54  ;;  %v2561_v47 = vld [vmem:[%s3035_s11 + $0x8] sm:$0xff]   ;;  %v2135_v48 = vld [vmem:[%s3034_s10] ss:$0 sm:$0xff]  ;;  %s2614_s11 = smov [#allocation5]  }
 0x1f9   :  { %v2270_v51 = vpop.f32.mrf.mxu1  ;;  %1685 = vmatprep.subr.bf16.mxu0 %v2534_v56  ;;  %s1960_s3 = sshll.u32 %s2614_s11, 4  ;;  %s1961_s3 = int_to_ptr.vmem [resolvable:$true] %s1960_s3 }
 0x1fa   :  { %2288 = vmatmul.mubr.bf16.vlgmr.msra.gmra.mxu1 %v1121_v50  ;;  %s2583_s10 = scalar_lea.vmem %s1961_s3, 64  ;;  %p2588_p6 = scmp.lt.s32.totalorder %s1961_s3, %s1961_s3 }
 0x1fb   :  { %2307 = vmatprep.mubr.msk.bf16.mxu1 %vm2612_vm2, %v2611_v9  ;;  %2292 = vmatpush3.bf16.msra.mxu1 %v2547_v4  ;;  %p2584_p5 = scmp.ne.s32.totalorder %s1961_s3, %s2583_s10  ;;  %p2589_p7 = scmp.lt.s32.totalorder %s2583_s10, %s2583_s10 }
 0x1fc   :  { %1686 = vmatpush1.bf16.msra.mxu0 %v2532_v57  ;;  %2293 = vmatprep.subr.bf16.mxu1 %v2611_v9 }
 0x1fd   :  { %1687 = vmatprep.subr.bf16.mxu0 %v2537_v58  ;;  %p2590_p8 = por %p2589_p7, %p2588_p6 }
 0x1ff   :  { %2294 = vmatpush3.bf16.msra.mxu1 %v2548_v5  ;;  %p2591_p9 = pnand %p2590_p8, %p2584_p5 }
 0x200   :  { %1688 = vmatpush1.bf16.msra.mxu0 %v2535_v59  ;;  %2295 = vmatprep.subr.bf16.mxu1 %v2611_v9 }
 0x201   :  { %1689 = vmatprep.subr.bf16.mxu0 %v2540_v61 }
 0x203   :  { %2296 = vmatpush3.bf16.msra.mxu1 %v2549_v6 }
 0x204   :  { %1690 = vmatpush1.bf16.msra.mxu0 %v2538_v62  ;;  %2297 = vmatprep.subr.bf16.mxu1 %v2611_v9 }
 0x205   :  { %1691 = vmatprep.subr.bf16.mxu0 %v2543_v63 }
 0x207   :  { %2298 = vmatpush3.bf16.msra.mxu1 %v2550_v8 }
 0x208   :  { %1692 = vmatpush1.bf16.msra.mxu0 %v2541_v1  ;;  %2299 = vmatprep.subr.bf16.mxu1 %v2611_v9 }
 0x209   :  { %1693 = vmatprep.subr.bf16.mxu0 %v2546_v2 }
 0x20b   :  { %2300 = vmatpush3.bf16.msra.mxu1 %v2551_v10 }
 0x20c   :  { %1694 = vmatpush1.bf16.msra.mxu0 %v2544_v3  ;;  %2301 = vmatprep.subr.bf16.mxu1 %v2611_v9 }
 0x20d   :  { %2311 = vmatprep.subr.bf16.mxu0 %v2611_v9 }
 0x20f   :  { %2302 = vmatpush3.bf16.msra.mxu1 %v2552_v11 }
 0x210   :  { %2303 = vmatprep.subr.bf16.mxu1 %v2611_v9 }
 0x213   :  { %2304 = vmatpush3.bf16.msra.mxu1 %v2553_v31 }
 0x214   :  { %2305 = vmatprep.subr.bf16.mxu1 %v2611_v9 }
 0x217   :  { %2306 = vmatpush3.bf16.msra.mxu1 %v2554_v32 }
 0x26d   :  { %v2198_v12 = vpop.f32.mrf.mxu1 }
 0x26f   :  { %v2199_v13 = vpop.f32.mrf.mxu1 }
 0x270   :  { %v2200_v14 = vadd.f32 %v2199_v13, %v2198_v12 }
 0x271   :  { %v2201_v15 = vpop.f32.mrf.mxu1 }
 0x272   :  { %v1484_v22 = vadd.f32 %v2200_v14, %v2078_v20 }
 0x273   :  { %v2202_v16 = vpop.f32.mrf.mxu1 }
 0x2af   :  { %v2220_v7 = vpop.f32.mrf.mxu0 }
 0x2b1   :  { %v2221_v18 = vpop.f32.mrf.mxu0 }
 0x2b2   :  { %v2222_v21 = vadd.f32 %v2221_v18, %v2220_v7 }
 0x2b3   :  { %v2223_v19 = vpop.f32.mrf.mxu0 }
 0x2b4   :  { %v1524_v23 = vadd.f32 %v2222_v21, %v1484_v22 }
 0x2b5   :  { %v2224_v17 = vpop.f32.mrf.mxu0 }
 0x2ba   :  { %v1563_v24 = vpop.f32.mrf.mxu1 }
 0x2bb   :  { %v1564_v25 = vadd.f32 %v1563_v24, %v1524_v23 }
 0x2bc   :  { %v2289_v26 = vpop.f32.mrf.mxu1 }
 0x2bd   :  { %v1569_v27 = vmax.f32 %v1564_v25, 0.0 }
 0x2be   :  { %v1566_v28 = vpop.f32.mrf.mxu1 }
 0x2bf   :  { %v1570_v29 = vpack.c.bf16 %v1569_v27, %v1569_v27 }
 0x2c0   :  { %v2290_v30 = vpop.f32.mrf.mxu1 }
 0x2c1   :  { %1712 = vmatmul.mubr.bf16.vlgmr.msra.gmra.mxu0 %v1570_v29 }
 0x2c2   :  { %2327 = vmatprep.mubr.msk.bf16.mxu0 %vm2612_vm2, %v2611_v9  ;;  %2312 = vmatpush3.bf16.msra.mxu0 %v2555_v33 }
 0x2c3   :  { %2313 = vmatprep.subr.bf16.mxu0 %v2611_v9 }
 0x2c6   :  { %2314 = vmatpush3.bf16.msra.mxu0 %v2556_v35 }
 0x2c7   :  { %2315 = vmatprep.subr.bf16.mxu0 %v2611_v9 }
 0x2ca   :  { %2316 = vmatpush3.bf16.msra.mxu0 %v2557_v38 }
 0x2cb   :  { %2317 = vmatprep.subr.bf16.mxu0 %v2611_v9 }
 0x2ce   :  { %2318 = vmatpush3.bf16.msra.mxu0 %v2558_v53 }
 0x2cf   :  { %2319 = vmatprep.subr.bf16.mxu0 %v2611_v9 }
 0x2d2   :  { %2320 = vmatpush3.bf16.msra.mxu0 %v2559_v45 }
 0x2d3   :  { %2321 = vmatprep.subr.bf16.mxu0 %v2611_v9 }
 0x2d6   :  { %2322 = vmatpush3.bf16.msra.mxu0 %v2560_v46 }
 0x2d7   :  { %2323 = vmatprep.subr.bf16.mxu0 %v2611_v9 }
 0x2da   :  { %2324 = vmatpush3.bf16.msra.mxu0 %v2561_v47 }
 0x2db   :  { %2325 = vmatprep.subr.bf16.mxu0 %v2611_v9  ;;  %v2144_v9 = vld [vmem:[%s3036_s12] ss:$0 sm:$0xff] }
 0x2de   :  { %2326 = vmatpush3.bf16.msra.mxu0 %v2562_v0 }
 0x381   :  { %v1713_v39 = vpop.f32.mrf.mxu0 }
 0x382   :  { %v1714_v40 = vadd.f32 %v1713_v39, %v1592_v36 }
 0x383   :  { %v1715_v60 = vpop.f32.mrf.mxu0 }
 0x384   :  { %v1720_v41 = vmax.f32 %v1714_v40, 0.0  ;;  %v1716_v42 = vadd.f32 %v1715_v60, %v1596_v37 }
 0x385   :  { %v1717_v43 = vpop.f32.mrf.mxu0 }
 0x386   :  { %v1722_v55 = vpack.c.bf16 %v1720_v41, %v1720_v41  ;;  %v1721_v44 = vmax.f32 %v1716_v42, 0.0 }
 0x387   :  { %v1718_v52 = vpop.f32.mrf.mxu0 }
 0x388   :  { %2308 = vmatmul.mubr.bf16.vlgmr.msra.gmra.mxu1 %v1722_v55  ;;  %1836 = vrot.lane.b32.xlu0 %v1721_v44, %s2613_s26 }
 0x3fa   :  { %v1837_v56 = vpop.permute.xlu0 %1836 }
 0x448   :  { %v1828_v49 = vpop.f32.mrf.mxu1 }
 0x449   :  { %v1829_v50 = vadd.f32 %v2135_v48, %v1828_v49 }
 0x44a   :  { %v2309_v51 = vpop.f32.mrf.mxu1 }
 0x44b   :  { %v1834_v54 = vmax.f32 %v1829_v50, 0.0 }
 0x44c   :  { %v1831_v57 = vpop.f32.mrf.mxu1 }
 0x44d   :  { %v1839_v58 = vsel %vm864_vm3, %v1834_v54, %v1837_v56 }
 0x44e   :  { %v1840_v59 = vpack.c.bf16 %v1839_v58, %v1839_v58  ;;  %v2310_v61 = vpop.f32.mrf.mxu1 }
 0x450   :  { %2328 = vmatmul.mubr.bf16.vlgmr.msra.gmra.mxu0 %v1840_v59 }
 0x510   :  { %v1946_v62 = vpop.f32.mrf.mxu0 }
 0x511   :  { %v1947_v63 = vadd.f32 %v2144_v9, %v1946_v62 }
 0x512   :  { %v2329_v1 = vpop.f32.mrf.mxu0 }
 0x513   :  { %1953 = vst.msk [vmem:[#allocation5] sm:$0xf] %vm1952_vm4, %v1947_v63 }
 0x514   :  { %v1949_v2 = vpop.f32.mrf.mxu0 }
 0x515   :  { %2594 = shalt.err (!%p2591_p9)
}
 0x516   :  { %1963 = dma.vmem_to_hbm [thread:$0]  %s1961_s3, 64, %s3037_s13, [#allocation4]   ;;  %v2330_v3 = vpop.f32.mrf.mxu0 }
 0x517   :  { %2605 = dma.done.wait [#allocation4], 64  }
 0x518   :  { %2606 = vsyncadd [#allocation4], 4294967232 }
 0x519   :  { %1967 = vsyncpa [#allocation3], 1 }
 0x51a   :  { %1968 = vsyncpa [#allocation4], 1 }

</bundles_post_ra>
